<compile_context>
chip_gen: v7x
topology: tpu7x:2x2x1
jax: 0.10.0
libtpu: 0.0.40
codegen_flags: <defaults>
</compile_context>

<pallas_src>
import math
import numpy as np
import jax
import jax.numpy as jnp
from jax.experimental import pallas as pl
from jax.experimental.pallas import tpu as pltpu

EPS = 1e-5


# ---------------------------------------------------------------- kernel ----

def _up_fused_kernel(m_ref, n_ref, wupT_ref, bup_ref, pT_ref,
                     scale_m_ref, shift_m_ref, scale_n_ref, shift_n_ref,
                     wst_ref, wsb_ref, wct_ref, wcb_ref, btot_ref,
                     o_ref):
    m_b = m_ref[0]                       # (Cin, H*W)   channel-major
    n_b = n_ref[0]                       # (Co, Hn*Wn)
    wupT = wupT_ref[...]                 # (Co, Cin)
    cin = wupT.shape[1]

    # self.up : 1x1 conv.  K = Cin is tiny -> VPU broadcast-FMAs, not the MXU.
    mp = bup_ref[...] + wupT[:, 0:1] * m_b[0:1, :]
    for c in range(1, cin):
        mp = mp + wupT[:, c:c + 1] * m_b[c:c + 1, :]          # (Co, H*W)

    # bilinear x2 (align_corners=True) + F.pad as one precomputed operator.
    m_pad = jnp.dot(mp, pT_ref[...],
                    preferred_element_type=jnp.float32)       # (Co, M)

    # add-module: BN (inference) + LeakyReLU(0.2), split into concat halves so
    # the channel concat is never materialized.
    bn_m = m_pad * scale_m_ref[...] + shift_m_ref[...]
    bn_n = n_b * scale_n_ref[...] + shift_n_ref[...]
    lr_m = jnp.where(bn_m >= 0, bn_m, 0.2 * bn_m)
    lr_n = jnp.where(bn_n >= 0, bn_n, 0.2 * bn_n)

    # (x + lr@Wa + ba)@Ws + bs  ==  x@Ws + lr@(Wa@Ws) + (ba@Ws + bs),
    # each weight split into its top/bottom Co-row block (transposed for the
    # channel-major layout).
    out = (jnp.dot(wst_ref[...], m_pad, preferred_element_type=jnp.float32)
           + jnp.dot(wsb_ref[...], n_b, preferred_element_type=jnp.float32)
           + jnp.dot(wct_ref[...], lr_m, preferred_element_type=jnp.float32)
           + jnp.dot(wcb_ref[...], lr_n, preferred_element_type=jnp.float32)
           + btot_ref[...])
    o_ref[0] = out


# ------------------------------------------------------------------- glue ---

def _interp_matrix_np(in_size, out_size):
    # 1-D linear interpolation with align_corners=True (matches torch
    # F.interpolate bilinear / align_corners=True, per axis).
    i = np.arange(out_size, dtype=np.float64)
    src = np.zeros(out_size) if out_size == 1 else i * (in_size - 1) / (out_size - 1)
    lo = np.clip(np.floor(src).astype(np.int64), 0, in_size - 1)
    hi = np.clip(lo + 1, 0, in_size - 1)
    frac = src - lo
    A = np.zeros((out_size, in_size), np.float32)
    A[np.arange(out_size), lo] += (1.0 - frac).astype(np.float32)
    A[np.arange(out_size), hi] += frac.astype(np.float32)
    return A


def _upsample_pad_operator(H, W, Hn, Wn):
    """(Hn*Wn, H*W) operator: bilinear x2 (align_corners=True) then F.pad
    with the original module's (swapped-axis) pad assignment."""
    H2, W2 = 2 * H, 2 * W
    A_H = _interp_matrix_np(H, H2)
    A_W = _interp_matrix_np(W, W2)
    U = np.kron(A_H, A_W)                       # (H2*W2, H*W)
    # Faithful to the torch code: X = n.H - m.H pads W, Y = n.W - m.W pads H.
    X = Hn - H2
    Y = Wn - W2
    assert H2 + Y == Hn and W2 + X == Wn, "pad/cat sizes inconsistent (as in torch)"
    pad_h_top = math.ceil(Y / 2)
    pad_w_left = math.ceil(X / 2)
    P = np.zeros((Hn * Wn, H * W), np.float32)
    for I in range(Hn):
        iu = I - pad_h_top
        if not (0 <= iu < H2):
            continue
        for J in range(Wn):
            ju = J - pad_w_left
            if 0 <= ju < W2:
                P[I * Wn + J, :] = U[iu * W2 + ju, :]
    return P


@jax.jit
def up_forward(m_nchw, n_nchw, params):
    """Pallas implementation of up.forward(m, n).  NCHW in / NCHW out."""
    N, Cin, H, W = m_nchw.shape
    _, Co, Hn, Wn = n_nchw.shape
    HW, M = H * W, Hn * Wn

    m3 = m_nchw.reshape(N, Cin, HW).astype(jnp.float32)   # free reshape
    n3 = n_nchw.reshape(N, Co, M).astype(jnp.float32)     # free reshape

    # --- static / folded weight preprocessing (tiny, folded into the jit) ---
    pT = jnp.asarray(_upsample_pad_operator(H, W, Hn, Wn).T)   # (HW, M)
    wupT = params["w_up"].T                                    # (Co, Cin)
    bup = params["b_up"].reshape(Co, 1)
    scale = params["gamma"] / jnp.sqrt(params["var"] + EPS)    # (2*Co,)
    shift = params["beta"] - params["mean"] * scale
    w_s = params["w_smooth"]                                   # (2*Co, Co)
    wc = params["w_add"] @ w_s                                 # (2*Co, Co)
    btot = (w_s.T @ params["b_add"] + params["b_smooth"]).reshape(Co, 1)

    vec = lambda: pl.BlockSpec((Co, 1), lambda b: (0, 0))
    mat = lambda: pl.BlockSpec((Co, Co), lambda b: (0, 0))

    out = pl.pallas_call(
        _up_fused_kernel,
        out_shape=jax.ShapeDtypeStruct((N, Co, M), jnp.float32),
        grid=(N,),
        in_specs=[
            pl.BlockSpec((1, Cin, HW), lambda b: (b, 0, 0)),   # m   (per batch)
            pl.BlockSpec((1, Co, M), lambda b: (b, 0, 0)),     # n   (per batch)
            pl.BlockSpec((Co, Cin), lambda b: (0, 0)),         # w_up^T
            vec(),                                             # b_up
            pl.BlockSpec((HW, M), lambda b: (0, 0)),           # P^T (upsample+pad)
            vec(), vec(), vec(), vec(),                        # BN scale/shift halves
            mat(), mat(), mat(), mat(),                        # Ws / Wa@Ws halves^T
            vec(),                                             # folded bias
        ],
        out_specs=pl.BlockSpec((1, Co, M), lambda b: (b, 0, 0)),
        compiler_params=pltpu.CompilerParams(
            dimension_semantics=("parallel",)),
    )(m3, n3, wupT, bup, pT,
      scale[:Co].reshape(Co, 1), shift[:Co].reshape(Co, 1),
      scale[Co:].reshape(Co, 1), shift[Co:].reshape(Co, 1),
      w_s[:Co].T, w_s[Co:].T, wc[:Co].T, wc[Co:].T, btot)

    return out.reshape(N, Co, Hn, Wn)   # already NCHW; reshape is free


# --------------------------------------------------------------- reference --

def reference(m_nchw, n_nchw, p):
    m = jnp.transpose(m_nchw, (0, 2, 3, 1))
    n = jnp.transpose(n_nchw, (0, 2, 3, 1))
    _, H, W, _ = m.shape
    Hn, Wn = n.shape[1], n.shape[2]
    mp = m @ p["w_up"] + p["b_up"]
    A_H = jnp.asarray(_interp_matrix_np(H, 2 * H))
    A_W = jnp.asarray(_interp_matrix_np(W, 2 * W))
    up_ = jnp.einsum("Hh,Ww,nhwc->nHWc", A_H, A_W, mp)
    X = Hn - 2 * H
    Y = Wn - 2 * W
    up_ = jnp.pad(up_, ((0, 0),
                        (math.ceil(Y / 2), math.floor(Y / 2)),
                        (math.ceil(X / 2), math.floor(X / 2)),
                        (0, 0)))
    x = jnp.concatenate([up_, n], axis=-1)
    scale = p["gamma"] / jnp.sqrt(p["var"] + EPS)
    shift = p["beta"] - p["mean"] * scale
    bn = x * scale + shift
    lr = jnp.where(bn >= 0, bn, 0.2 * bn)
    out = lr @ p["w_add"] + p["b_add"]
    res = (x + out) @ p["w_smooth"] + p["b_smooth"]
    return jnp.transpose(res, (0, 3, 1, 2))


# -------------------------------------------------------------------- main --

if __name__ == "__main__":
    inplanes, outplanes = 4, 8
    N, H, W = 2, 8, 8                   # m spatial; n spatial is 2x -> 16x16
    C2 = 2 * outplanes

    key = jax.random.PRNGKey(0)
    ks = jax.random.split(key, 12)

    params = {
        # self.up : Conv2d(inplanes, outplanes, 1)  -> stored as (Cin, Cout)
        "w_up": 0.1 * jax.random.normal(ks[0], (inplanes, outplanes), jnp.float32),
        "b_up": 0.1 * jax.random.normal(ks[1], (outplanes,), jnp.float32),
        # add.add : BatchNorm2d(C2) (inference stats) + Conv2d(C2, C2, 1)
        "gamma": 1.0 + 0.1 * jax.random.normal(ks[2], (C2,), jnp.float32),
        "beta": 0.1 * jax.random.normal(ks[3], (C2,), jnp.float32),
        "mean": 0.1 * jax.random.normal(ks[4], (C2,), jnp.float32),
        "var": jax.random.uniform(ks[5], (C2,), jnp.float32, 0.5, 1.5),
        "w_add": 0.1 * jax.random.normal(ks[6], (C2, C2), jnp.float32),
        "b_add": 0.1 * jax.random.normal(ks[7], (C2,), jnp.float32),
        # add.smooth : Conv2d(C2, outplanes, 1)
        "w_smooth": 0.1 * jax.random.normal(ks[8], (C2, outplanes), jnp.float32),
        "b_smooth": 0.1 * jax.random.normal(ks[9], (outplanes,), jnp.float32),
    }

    m = jax.random.normal(ks[10], (N, inplanes, H, W), jnp.float32)      # NCHW
    n = jax.random.normal(ks[11], (N, outplanes, 2 * H, 2 * W), jnp.float32)

    out = jax.block_until_ready(up_forward(m, n, params))
    ref = jax.block_until_ready(reference(m, n, params))

    assert out.shape == (N, outplanes, 2 * H, 2 * W), out.shape
    assert jnp.allclose(out, ref, rtol=1e-4, atol=1e-4), float(
        jnp.max(jnp.abs(out - ref)))
    print("KERNEL_OK")
</pallas_src>

<mosaic_0001>
module attributes {stable_mosaic.version = 11 : i64} {
  func.func @_up_fused_kernel(%arg0: i32, %arg1: memref<1x4x64xf32, #tpu.memory_space<vmem>>, %arg2: memref<1x8x256xf32, #tpu.memory_space<vmem>>, %arg3: memref<8x4xf32, #tpu.memory_space<vmem>>, %arg4: memref<8x1xf32, #tpu.memory_space<vmem>>, %arg5: memref<64x256xf32, #tpu.memory_space<vmem>>, %arg6: memref<8x1xf32, #tpu.memory_space<vmem>>, %arg7: memref<8x1xf32, #tpu.memory_space<vmem>>, %arg8: memref<8x1xf32, #tpu.memory_space<vmem>>, %arg9: memref<8x1xf32, #tpu.memory_space<vmem>>, %arg10: memref<8x8xf32, #tpu.memory_space<vmem>>, %arg11: memref<8x8xf32, #tpu.memory_space<vmem>>, %arg12: memref<8x8xf32, #tpu.memory_space<vmem>>, %arg13: memref<8x8xf32, #tpu.memory_space<vmem>>, %arg14: memref<8x1xf32, #tpu.memory_space<vmem>>, %arg15: memref<1x8x256xf32, #tpu.memory_space<vmem>>) attributes {dimension_semantics = [#tpu.dimension_semantics<parallel>], iteration_bounds = array<i64: 2>, scalar_prefetch = 0 : i64, scratch_operands = 0 : i64, tpu.core_type = #tpu.core_type<tc>, window_params = [{transform_indices = @transform_0, window_bounds = array<i64: 1, 4, 64>}, {transform_indices = @transform_1, window_bounds = array<i64: 1, 8, 256>}, {pipeline_mode = #tpu.pipeline_mode<synchronous>, transform_indices = @transform_2, window_bounds = array<i64: 8, 4>}, {pipeline_mode = #tpu.pipeline_mode<synchronous>, transform_indices = @transform_3, window_bounds = array<i64: 8, 1>}, {pipeline_mode = #tpu.pipeline_mode<synchronous>, transform_indices = @transform_4, window_bounds = array<i64: 64, 256>}, {pipeline_mode = #tpu.pipeline_mode<synchronous>, transform_indices = @transform_5, window_bounds = array<i64: 8, 1>}, {pipeline_mode = #tpu.pipeline_mode<synchronous>, transform_indices = @transform_6, window_bounds = array<i64: 8, 1>}, {pipeline_mode = #tpu.pipeline_mode<synchronous>, transform_indices = @transform_7, window_bounds = array<i64: 8, 1>}, {pipeline_mode = #tpu.pipeline_mode<synchronous>, transform_indices = @transform_8, window_bounds = array<i64: 8, 1>}, {pipeline_mode = #tpu.pipeline_mode<synchronous>, transform_indices = @transform_9, window_bounds = array<i64: 8, 8>}, {pipeline_mode = #tpu.pipeline_mode<synchronous>, transform_indices = @transform_10, window_bounds = array<i64: 8, 8>}, {pipeline_mode = #tpu.pipeline_mode<synchronous>, transform_indices = @transform_11, window_bounds = array<i64: 8, 8>}, {pipeline_mode = #tpu.pipeline_mode<synchronous>, transform_indices = @transform_12, window_bounds = array<i64: 8, 8>}, {pipeline_mode = #tpu.pipeline_mode<synchronous>, transform_indices = @transform_13, window_bounds = array<i64: 8, 1>}, {transform_indices = @transform_14, window_bounds = array<i64: 1, 8, 256>}]} {
    %c0 = arith.constant 0 : index
    %c0_0 = arith.constant 0 : index
    %c0_1 = arith.constant 0 : index
    %0 = vector.load %arg1[%c0, %c0_0, %c0_1] : memref<1x4x64xf32, #tpu.memory_space<vmem>>, vector<1x4x64xf32>
    %1 = vector.shape_cast %0 : vector<1x4x64xf32> to vector<4x64xf32>
    %c0_2 = arith.constant 0 : index
    %c0_3 = arith.constant 0 : index
    %c0_4 = arith.constant 0 : index
    %2 = vector.load %arg2[%c0_2, %c0_3, %c0_4] : memref<1x8x256xf32, #tpu.memory_space<vmem>>, vector<1x8x256xf32>
    %3 = vector.shape_cast %2 : vector<1x8x256xf32> to vector<8x256xf32>
    %c0_5 = arith.constant 0 : index
    %c0_6 = arith.constant 0 : index
    %4 = vector.load %arg3[%c0_5, %c0_6] : memref<8x4xf32, #tpu.memory_space<vmem>>, vector<8x4xf32>
    %c0_7 = arith.constant 0 : index
    %c0_8 = arith.constant 0 : index
    %5 = vector.load %arg4[%c0_7, %c0_8] : memref<8x1xf32, #tpu.memory_space<vmem>>, vector<8x1xf32>
    %6 = vector.extract_strided_slice %4 {offsets = [0, 0], sizes = [8, 1], strides = [1, 1]} : vector<8x4xf32> to vector<8x1xf32>
    %7 = vector.extract_strided_slice %1 {offsets = [0, 0], sizes = [1, 64], strides = [1, 1]} : vector<4x64xf32> to vector<1x64xf32>
    %8 = vector.broadcast %6 : vector<8x1xf32> to vector<8x64xf32>
    %9 = vector.broadcast %7 : vector<1x64xf32> to vector<8x64xf32>
    %10 = arith.mulf %8, %9 : vector<8x64xf32>
    %11 = vector.broadcast %5 : vector<8x1xf32> to vector<8x64xf32>
    %12 = arith.addf %11, %10 : vector<8x64xf32>
    %13 = vector.extract_strided_slice %4 {offsets = [0, 1], sizes = [8, 1], strides = [1, 1]} : vector<8x4xf32> to vector<8x1xf32>
    %14 = vector.extract_strided_slice %1 {offsets = [1, 0], sizes = [1, 64], strides = [1, 1]} : vector<4x64xf32> to vector<1x64xf32>
    %15 = vector.broadcast %13 : vector<8x1xf32> to vector<8x64xf32>
    %16 = vector.broadcast %14 : vector<1x64xf32> to vector<8x64xf32>
    %17 = arith.mulf %15, %16 : vector<8x64xf32>
    %18 = arith.addf %12, %17 : vector<8x64xf32>
    %19 = vector.extract_strided_slice %4 {offsets = [0, 2], sizes = [8, 1], strides = [1, 1]} : vector<8x4xf32> to vector<8x1xf32>
    %20 = vector.extract_strided_slice %1 {offsets = [2, 0], sizes = [1, 64], strides = [1, 1]} : vector<4x64xf32> to vector<1x64xf32>
    %21 = vector.broadcast %19 : vector<8x1xf32> to vector<8x64xf32>
    %22 = vector.broadcast %20 : vector<1x64xf32> to vector<8x64xf32>
    %23 = arith.mulf %21, %22 : vector<8x64xf32>
    %24 = arith.addf %18, %23 : vector<8x64xf32>
    %25 = vector.extract_strided_slice %4 {offsets = [0, 3], sizes = [8, 1], strides = [1, 1]} : vector<8x4xf32> to vector<8x1xf32>
    %26 = vector.extract_strided_slice %1 {offsets = [3, 0], sizes = [1, 64], strides = [1, 1]} : vector<4x64xf32> to vector<1x64xf32>
    %27 = vector.broadcast %25 : vector<8x1xf32> to vector<8x64xf32>
    %28 = vector.broadcast %26 : vector<1x64xf32> to vector<8x64xf32>
    %29 = arith.mulf %27, %28 : vector<8x64xf32>
    %30 = arith.addf %24, %29 : vector<8x64xf32>
    %c0_9 = arith.constant 0 : index
    %c0_10 = arith.constant 0 : index
    %31 = vector.load %arg5[%c0_9, %c0_10] : memref<64x256xf32, #tpu.memory_space<vmem>>, vector<64x256xf32>
    %cst = arith.constant dense<0.000000e+00> : vector<8x256xf32>
    %32 = tpu.matmul %30, %31, %cst {dimension_numbers = #tpu.dot_dimension_numbers<[1], [0], [0], [1], [0, 0, 1, 1], [], []>} : vector<8x64xf32>, vector<64x256xf32>, vector<8x256xf32> -> vector<8x256xf32>
    %c0_11 = arith.constant 0 : index
    %c0_12 = arith.constant 0 : index
    %33 = vector.load %arg6[%c0_11, %c0_12] : memref<8x1xf32, #tpu.memory_space<vmem>>, vector<8x1xf32>
    %34 = vector.broadcast %33 : vector<8x1xf32> to vector<8x256xf32>
    %35 = arith.mulf %32, %34 : vector<8x256xf32>
    %c0_13 = arith.constant 0 : index
    %c0_14 = arith.constant 0 : index
    %36 = vector.load %arg7[%c0_13, %c0_14] : memref<8x1xf32, #tpu.memory_space<vmem>>, vector<8x1xf32>
    %37 = vector.broadcast %36 : vector<8x1xf32> to vector<8x256xf32>
    %38 = arith.addf %35, %37 : vector<8x256xf32>
    %c0_15 = arith.constant 0 : index
    %c0_16 = arith.constant 0 : index
    %39 = vector.load %arg8[%c0_15, %c0_16] : memref<8x1xf32, #tpu.memory_space<vmem>>, vector<8x1xf32>
    %40 = vector.broadcast %39 : vector<8x1xf32> to vector<8x256xf32>
    %41 = arith.mulf %3, %40 : vector<8x256xf32>
    %c0_17 = arith.constant 0 : index
    %c0_18 = arith.constant 0 : index
    %42 = vector.load %arg9[%c0_17, %c0_18] : memref<8x1xf32, #tpu.memory_space<vmem>>, vector<8x1xf32>
    %43 = vector.broadcast %42 : vector<8x1xf32> to vector<8x256xf32>
    %44 = arith.addf %41, %43 : vector<8x256xf32>
    %cst_19 = arith.constant 0.000000e+00 : f32
    %45 = vector.broadcast %cst_19 : f32 to vector<8x256xf32>
    %46 = arith.cmpf oge, %38, %45 : vector<8x256xf32>
    %cst_20 = arith.constant 2.000000e-01 : f32
    %47 = vector.broadcast %cst_20 : f32 to vector<8x256xf32>
    %48 = arith.mulf %47, %38 : vector<8x256xf32>
    %49 = arith.select %46, %38, %48 : vector<8x256xi1>, vector<8x256xf32>
    %cst_21 = arith.constant 0.000000e+00 : f32
    %50 = vector.broadcast %cst_21 : f32 to vector<8x256xf32>
    %51 = arith.cmpf oge, %44, %50 : vector<8x256xf32>
    %cst_22 = arith.constant 2.000000e-01 : f32
    %52 = vector.broadcast %cst_22 : f32 to vector<8x256xf32>
    %53 = arith.mulf %52, %44 : vector<8x256xf32>
    %54 = arith.select %51, %44, %53 : vector<8x256xi1>, vector<8x256xf32>
    %c0_23 = arith.constant 0 : index
    %c0_24 = arith.constant 0 : index
    %55 = vector.load %arg10[%c0_23, %c0_24] : memref<8x8xf32, #tpu.memory_space<vmem>>, vector<8x8xf32>
    %cst_25 = arith.constant dense<0.000000e+00> : vector<8x256xf32>
    %56 = tpu.matmul %55, %32, %cst_25 {dimension_numbers = #tpu.dot_dimension_numbers<[1], [0], [0], [1], [0, 0, 1, 1], [], []>} : vector<8x8xf32>, vector<8x256xf32>, vector<8x256xf32> -> vector<8x256xf32>
    %c0_26 = arith.constant 0 : index
    %c0_27 = arith.constant 0 : index
    %57 = vector.load %arg11[%c0_26, %c0_27] : memref<8x8xf32, #tpu.memory_space<vmem>>, vector<8x8xf32>
    %cst_28 = arith.constant dense<0.000000e+00> : vector<8x256xf32>
    %58 = tpu.matmul %57, %3, %cst_28 {dimension_numbers = #tpu.dot_dimension_numbers<[1], [0], [0], [1], [0, 0, 1, 1], [], []>} : vector<8x8xf32>, vector<8x256xf32>, vector<8x256xf32> -> vector<8x256xf32>
    %59 = arith.addf %56, %58 : vector<8x256xf32>
    %c0_29 = arith.constant 0 : index
    %c0_30 = arith.constant 0 : index
    %60 = vector.load %arg12[%c0_29, %c0_30] : memref<8x8xf32, #tpu.memory_space<vmem>>, vector<8x8xf32>
    %cst_31 = arith.constant dense<0.000000e+00> : vector<8x256xf32>
    %61 = tpu.matmul %60, %49, %cst_31 {dimension_numbers = #tpu.dot_dimension_numbers<[1], [0], [0], [1], [0, 0, 1, 1], [], []>} : vector<8x8xf32>, vector<8x256xf32>, vector<8x256xf32> -> vector<8x256xf32>
    %62 = arith.addf %59, %61 : vector<8x256xf32>
    %c0_32 = arith.constant 0 : index
    %c0_33 = arith.constant 0 : index
    %63 = vector.load %arg13[%c0_32, %c0_33] : memref<8x8xf32, #tpu.memory_space<vmem>>, vector<8x8xf32>
    %cst_34 = arith.constant dense<0.000000e+00> : vector<8x256xf32>
    %64 = tpu.matmul %63, %54, %cst_34 {dimension_numbers = #tpu.dot_dimension_numbers<[1], [0], [0], [1], [0, 0, 1, 1], [], []>} : vector<8x8xf32>, vector<8x256xf32>, vector<8x256xf32> -> vector<8x256xf32>
    %65 = arith.addf %62, %64 : vector<8x256xf32>
    %c0_35 = arith.constant 0 : index
    %c0_36 = arith.constant 0 : index
    %66 = vector.load %arg14[%c0_35, %c0_36] : memref<8x1xf32, #tpu.memory_space<vmem>>, vector<8x1xf32>
    %67 = vector.broadcast %66 : vector<8x1xf32> to vector<8x256xf32>
    %68 = arith.addf %65, %67 : vector<8x256xf32>
    %c0_37 = arith.constant 0 : index
    %c0_38 = arith.constant 0 : index
    %c0_39 = arith.constant 0 : index
    %69 = vector.load %arg15[%c0_37, %c0_38, %c0_39] : memref<1x8x256xf32, #tpu.memory_space<vmem>>, vector<1x8x256xf32>
    %70 = vector.shape_cast %69 : vector<1x8x256xf32> to vector<8x256xf32>
    %71 = vector.shape_cast %68 : vector<8x256xf32> to vector<1x8x256xf32>
    tpu.vector_store %arg15[%c0_37, %c0_38, %c0_39], %71 {strides = array<i32>} : memref<1x8x256xf32, #tpu.memory_space<vmem>>, vector<1x8x256xf32>,
    return
  }
  func.func @transform_0(%arg0: i32) -> (i32, i32, i32) {
    %c0_i32 = arith.constant 0 : i32
    %c0_i32_0 = arith.constant 0 : i32
    %c0_i32_1 = arith.constant 0 : i32
    return %arg0, %c0_i32, %c0_i32_0 : i32, i32, i32
  }
  func.func @transform_1(%arg0: i32) -> (i32, i32, i32) {
    %c0_i32 = arith.constant 0 : i32
    %c0_i32_0 = arith.constant 0 : i32
    %c0_i32_1 = arith.constant 0 : i32
    return %arg0, %c0_i32, %c0_i32_0 : i32, i32, i32
  }
  func.func @transform_2(%arg0: i32) -> (i32, i32) {
    %c0_i32 = arith.constant 0 : i32
    %c0_i32_0 = arith.constant 0 : i32
    %c0_i32_1 = arith.constant 0 : i32
    return %c0_i32, %c0_i32_0 : i32, i32
  }
  func.func @transform_3(%arg0: i32) -> (i32, i32) {
    %c0_i32 = arith.constant 0 : i32
    %c0_i32_0 = arith.constant 0 : i32
    %c0_i32_1 = arith.constant 0 : i32
    return %c0_i32, %c0_i32_0 : i32, i32
  }
  func.func @transform_4(%arg0: i32) -> (i32, i32) {
    %c0_i32 = arith.constant 0 : i32
    %c0_i32_0 = arith.constant 0 : i32
    %c0_i32_1 = arith.constant 0 : i32
    return %c0_i32, %c0_i32_0 : i32, i32
  }
  func.func @transform_5(%arg0: i32) -> (i32, i32) {
    %c0_i32 = arith.constant 0 : i32
    %c0_i32_0 = arith.constant 0 : i32
    %c0_i32_1 = arith.constant 0 : i32
    return %c0_i32, %c0_i32_0 : i32, i32
  }
  func.func @transform_6(%arg0: i32) -> (i32, i32) {
    %c0_i32 = arith.constant 0 : i32
    %c0_i32_0 = arith.constant 0 : i32
    %c0_i32_1 = arith.constant 0 : i32
    return %c0_i32, %c0_i32_0 : i32, i32
  }
  func.func @transform_7(%arg0: i32) -> (i32, i32) {
    %c0_i32 = arith.constant 0 : i32
    %c0_i32_0 = arith.constant 0 : i32
    %c0_i32_1 = arith.constant 0 : i32
    return %c0_i32, %c0_i32_0 : i32, i32
  }
  func.func @transform_8(%arg0: i32) -> (i32, i32) {
    %c0_i32 = arith.constant 0 : i32
    %c0_i32_0 = arith.constant 0 : i32
    %c0_i32_1 = arith.constant 0 : i32
    return %c0_i32, %c0_i32_0 : i32, i32
  }
  func.func @transform_9(%arg0: i32) -> (i32, i32) {
    %c0_i32 = arith.constant 0 : i32
    %c0_i32_0 = arith.constant 0 : i32
    %c0_i32_1 = arith.constant 0 : i32
    return %c0_i32, %c0_i32_0 : i32, i32
  }
  func.func @transform_10(%arg0: i32) -> (i32, i32) {
    %c0_i32 = arith.constant 0 : i32
    %c0_i32_0 = arith.constant 0 : i32
    %c0_i32_1 = arith.constant 0 : i32
    return %c0_i32, %c0_i32_0 : i32, i32
  }
  func.func @transform_11(%arg0: i32) -> (i32, i32) {
    %c0_i32 = arith.constant 0 : i32
    %c0_i32_0 = arith.constant 0 : i32
    %c0_i32_1 = arith.constant 0 : i32
    return %c0_i32, %c0_i32_0 : i32, i32
  }
  func.func @transform_12(%arg0: i32) -> (i32, i32) {
    %c0_i32 = arith.constant 0 : i32
    %c0_i32_0 = arith.constant 0 : i32
    %c0_i32_1 = arith.constant 0 : i32
    return %c0_i32, %c0_i32_0 : i32, i32
  }
  func.func @transform_13(%arg0: i32) -> (i32, i32) {
    %c0_i32 = arith.constant 0 : i32
    %c0_i32_0 = arith.constant 0 : i32
    %c0_i32_1 = arith.constant 0 : i32
    return %c0_i32, %c0_i32_0 : i32, i32
  }
  func.func @transform_14(%arg0: i32) -> (i32, i32, i32) {
    %c0_i32 = arith.constant 0 : i32
    %c0_i32_0 = arith.constant 0 : i32
    %c0_i32_1 = arith.constant 0 : i32
    return %arg0, %c0_i32, %c0_i32_0 : i32, i32, i32
  }
}

</mosaic_0001>

<bundles_post_ra>
// kernel: up_forward.1
= control target key start
LH: loop header
LB: loop body
LE: loop exit
PB: predicated region body
PF: predicated region fallthrough
CT: control target
= control target key end

     0   :  { %s1201_s29 = smov 0   ;;  %s1323_s0 = inlined_call_operand.vmem [shape: f32[2,4,64], index: 0, kind: input, shape index: {}]   ;;  %s1324_s1 = inlined_call_operand.vmem [shape: f32[2,8,256], index: 1, kind: input, shape index: {}]   ;;  %s1325_s2 = inlined_call_operand.vmem [shape: f32[8,4], index: 2, kind: input, shape index: {}]   ;;  %s1326_s3 = inlined_call_operand.vmem [shape: f32[8,1], index: 3, kind: input, shape index: {}]   ;;  %s1327_s4 = inlined_call_operand.vmem [shape: f32[64,256], index: 4, kind: input, shape index: {}]   ;;  %s1328_s5 = inlined_call_operand.vmem [shape: f32[8,1], index: 5, kind: input, shape index: {}]   ;;  %s1329_s6 = inlined_call_operand.vmem [shape: f32[8,1], index: 6, kind: input, shape index: {}]   ;;  %s1330_s7 = inlined_call_operand.vmem [shape: f32[8,1], index: 7, kind: input, shape index: {}]   ;;  %s1331_s8 = inlined_call_operand.vmem [shape: f32[8,1], index: 8, kind: input, shape index: {}]   ;;  %s1332_s9 = inlined_call_operand.vmem [shape: f32[8,8], index: 9, kind: input, shape index: {}]   ;;  %s1333_s10 = inlined_call_operand.vmem [shape: f32[8,8], index: 10, kind: input, shape index: {}]   ;;  %s1334_s11 = inlined_call_operand.vmem [shape: f32[8,8], index: 11, kind: input, shape index: {}]   ;;  %s1335_s12 = inlined_call_operand.vmem [shape: f32[8,8], index: 12, kind: input, shape index: {}]   ;;  %s1336_s13 = inlined_call_operand.vmem [shape: f32[8,1], index: 13, kind: input, shape index: {}]   ;;  %s1337_s14 = inlined_call_operand.vmem [shape: f32[2,8,256], index: 14, kind: output, shape index: {}]  }
   0x1 LB: > { %s1053_s30 = sadd.s32 4294967295, %s1119_s29   ;;  %p1057_p0 = scmp.ge.s32.totalorder %s1119_s29, 1  ;;  %s1119_s29 = sphi %s1201_s29, %s24_s29  }
   0x2   : > { %p421_p1 = scmp.lt.s32.totalorder %s1119_s29, 3 }
   0x4   : > { %p422_p2 = pnand %p1057_p0, %p421_p1 }
   0x5   : > { %v488_v0 = vld [vmem:[%s1325_s2] sm:$0xff] (!%p422_p2)  ;;  %v1121_v1 = vmov (!%p422_p2), 0   ;;  %v1122_v2 = vmov (!%p422_p2), 1   ;;  %v537_v3 = vld [vmem:[%s1327_s4 + $0x8] sm:$0xff] (!%p422_p2)  ;;  %v539_v4 = vld [vmem:[%s1327_s4 + $0x18] sm:$0xff] (!%p422_p2)  ;;  %v1123_v18 = vmov (!%p422_p2), 2   ;;  %v495_v39 = vlaneseq (!%p422_p2) }
   0x6   : > { %425 = sbr.rel (%p422_p2) target bundleno = 595 (0x253), region = 76  ;;  %1107 = vset.pattern.permute.xlu0 (!%p422_p2), %v1121_v1  ;;  %1108 = vset.pattern.permute.xlu1 (!%p422_p2), %v1122_v2  ;;  %v536_v5 = vld [vmem:[%s1327_s4] sm:$0xff] (!%p422_p2)  ;;  %v1072_v6 = vpack.c.bf16 (!%p422_p2), %v539_v4, %v537_v3  ;;  %v538_v7 = vld [vmem:[%s1327_s4 + $0x10] sm:$0xff] (!%p422_p2)  ;;  %v541_v8 = vld [vmem:[%s1327_s4 + $0x28] sm:$0xff] (!%p422_p2)  ;;  %v1124_v25 = vmov (!%p422_p2), 3   ;;  %p471_p3 = scmp.lt.s32.totalorder (!%p422_p2), %s1053_s30, 1 }
   0x7   : > { %492 = vperm.xlu0 (!%p422_p2), %1107, %v488_v0   ;;  %507 = vperm.xlu1 (!%p422_p2), %1108, %v488_v0   ;;  %v543_v9 = vld [vmem:[%s1327_s4 + $0x38] sm:$0xff] (!%p422_p2)  ;;  %v489_v10 = vld [vmem:[%s1326_s3] sm:$0xff] (!%p422_p2)  ;;  %v1074_v11 = vpack.c.bf16 (!%p422_p2), %v538_v7, %v536_v5  ;;  %v542_v14 = vld [vmem:[%s1327_s4 + $0x30] sm:$0xff] (!%p422_p2)  ;;  %v1125_v30 = vmov (!%p422_p2), 0.0   ;;  %vm673_vm0 = vcmask (!%p422_p2), 64512   ;;  %v496_v40 = vshrl.u32 (!%p422_p2), %v495_v39, 7 }
   0x8   : > { %v1076_v12 = vpack.c.bf16 (!%p422_p2), %v543_v9, %v541_v8  ;;  %v540_v13 = vld [vmem:[%s1327_s4 + $0x20] sm:$0xff] (!%p422_p2)  ;;  %1073 = vmatprep.subr.bf16.mxu0 (!%p422_p2), %v1072_v6  ;;  %v545_v15 = vld [vmem:[%s1327_s4 + $0x48] sm:$0xff] (!%p422_p2)  ;;  %v547_v16 = vld [vmem:[%s1327_s4 + $0x58] sm:$0xff] (!%p422_p2)  ;;  %620 = vmatprep.mubr.f32.mxu0 (!%p422_p2), %v1125_v30  ;;  %vm552_vm1 = vcmask (!%p422_p2), 523264  }
   0x9   : > { %1075 = vmatpush1.bf16.msra.mxu0 (!%p422_p2), %v1074_v11  ;;  %v1078_v17 = vpack.c.bf16 (!%p422_p2), %v542_v14, %v540_v13  ;;  %v1080_v19 = vpack.c.bf16 (!%p422_p2), %v547_v16, %v545_v15  ;;  %v544_v20 = vld [vmem:[%s1327_s4 + $0x40] sm:$0xff] (!%p422_p2)  ;;  %v546_v21 = vld [vmem:[%s1327_s4 + $0x50] sm:$0xff] (!%p422_p2)  ;;  %v549_v22 = vld [vmem:[%s1327_s4 + $0x68] sm:$0xff] (!%p422_p2)  ;;  %741 = vmatprep.mubr.f32.mxu1 (!%p422_p2), %v1125_v30  ;;  %v497_v41 = vsub.s32 (!%p422_p2), 0, %v496_v40  ;;  %v512_v43 = vsub.s32 (!%p422_p2), 1, %v496_v40 }
   0xa   : > { %1077 = vmatprep.subr.bf16.mxu0 (!%p422_p2), %v1076_v12  ;;  %v551_v23 = vld [vmem:[%s1327_s4 + $0x78] sm:$0xff] (!%p422_p2)  ;;  %v1082_v24 = vpack.c.bf16 (!%p422_p2), %v546_v21, %v544_v20  ;;  %v548_v27 = vld [vmem:[%s1327_s4 + $0x60] sm:$0xff] (!%p422_p2)  ;;  %v550_v28 = vld [vmem:[%s1327_s4 + $0x70] sm:$0xff] (!%p422_p2)  ;;  %v522_v44 = vsub.s32 (!%p422_p2), 2, %v496_v40  ;;  %v532_v50 = vsub.s32 (!%p422_p2), 3, %v496_v40 }
   0xb   : > { %502 = vperm.xlu0 (!%p422_p2), %1107, %v489_v10   ;;  %1109 = vset.pattern.permute.xlu1 (!%p422_p2), %v1123_v18  ;;  %v1084_v26 = vpack.c.bf16 (!%p422_p2), %v551_v23, %v549_v22  ;;  %v1086_v29 = vpack.c.bf16 (!%p422_p2), %v550_v28, %v548_v27  ;;  %v627_v31 = vld [vmem:[%s1328_s5] sm:$0xff] (!%p422_p2) }
   0xc   : > { %517 = vperm.xlu1 (!%p422_p2), %1109, %v488_v0   ;;  %v643_v32 = vld [vmem:[%s1330_s7] sm:$0xff] (!%p422_p2) }
   0xd   : > { %1079 = vmatpush1.bf16.msra.mxu0 %v1078_v17  ;;  %s1339_s30 = smov (!%p471_p3, %s1053_s30), 1  ;;  %v635_v33 = vld [vmem:[%s1329_s6] sm:$0xff] }
   0xe   : > { %1081 = vmatprep.subr.bf16.mxu0 %v1080_v19  ;;  %s1070_s15 = sshll.u32 %s1339_s30, 4  ;;  %v651_v34 = vld [vmem:[%s1331_s8] sm:$0xff]  ;;  %s1058_s25 = sshll.u32 %s1339_s30, 2 }
   0xf   : > { %1110 = vset.pattern.permute.xlu0 %v1124_v25  ;;  %s479_s18 = scalar_lea.vmem %s1324_s1, %s1070_s15  ;;  %v976_v37 = vld [vmem:[%s1336_s13] sm:$0xff]  ;;  %s474_s28 = scalar_lea.vmem %s1323_s0, %s1058_s25 }
  0x10   : > { %527 = vperm.xlu0 %1110, %v488_v0   ;;  %1111 = vset.pattern.permute.xlu1 %v1121_v1  ;;  %v487_v35 = vld [vmem:[%s479_s18 + $0x8] sm:$0xff]  ;;  %v486_v36 = vld [vmem:[%s479_s18] sm:$0xff]  ;;  %s484_s24 = scalar_lea.vmem %s1337_s14, %s1070_s15 }
  0x11   : > { %1083 = vmatpush1.bf16.msra.mxu0 %v1082_v24  ;;  %630 = vperm.xlu1 %1111, %v627_v31   ;;  %v672_v38 = vld [vmem:[%s1333_s10] sm:$0xff] }
  0x12   : > { %1085 = vmatprep.subr.bf16.mxu0 %v1084_v26  ;;  %677 = vmatprep.subr.mxu1 %v487_v35  ;;  %v485_v42 = vld [vmem:[%s474_s28] sm:$0xf] }
  0x13   : > { %678 = vmatpush1.msra.mxu1 %v486_v36  ;;  %v498_v45 = vrot.slane %v485_v42, %v497_v41  ;;  %v513_v48 = vrot.slane %v485_v42, %v512_v43  ;;  %v523_v49 = vrot.slane %v485_v42, %v522_v44  ;;  %v533_v57 = vrot.slane %v485_v42, %v532_v50  ;;  %v671_v8 = vld [vmem:[%s1332_s9] sm:$0xff] }
  0x14   : > { %1112 = vset.pattern.permute.xlu0 %v1121_v1  ;;  %1064 = vmatmul.mubr.msk.f32.vlgmr.msra.gmra.mrb[0].mxu1 %vm673_vm0, %v672_v38  ;;  %v822_v20 = vld [vmem:[%s1334_s11] sm:$0xff] }
  0x15   : > { %1087 = vmatpush1.bf16.msra.mxu0 %v1086_v29  ;;  %646 = vperm.xlu0 %1112, %v643_v32   ;;  %v899_v23 = vld [vmem:[%s1335_s12] sm:$0xff] }
  0x16   : > { %638 = vperm.xlu1 %1111, %v635_v33   ;;  %815 = vmatprep.mubr.f32.mxu1 %v1125_v30 }
  0x1a   : > { %654 = vperm.xlu1 %1111, %v651_v34  }
  0x1e   : > { %979 = vperm.xlu1 %1111, %v976_v37  }
  0x86   : > { %v493_v46 = vpop.permute.xlu0 %492  ;;  %v508_v47 = vpop.permute.xlu1 %507 }
  0x87   : > { %v499_v51 = vmul.f32 %v498_v45, %v493_v46  ;;  %v514_v53 = vmul.f32 %v513_v48, %v508_v47 }
  0x8a   : > { %v503_v52 = vpop.permute.xlu0 %502 }
  0x8b   : > { %v505_v54 = vadd.f32 %v503_v52, %v499_v51  ;;  %v518_v55 = vpop.permute.xlu1 %517 }
  0x8c   : > { %v524_v56 = vmul.f32 %v523_v49, %v518_v55 }
  0x8d   : > { %v515_v58 = vadd.f32 %v514_v53, %v505_v54 }
  0x8f   : > { %v525_v59 = vadd.f32 %v524_v56, %v515_v58  ;;  %v528_v60 = vpop.permute.xlu0 %527 }
  0x90   : > { %v534_v61 = vmul.f32 %v533_v57, %v528_v60  ;;  %v631_v63 = vpop.permute.xlu1 %630 }
  0x92   : > { %v535_v62 = vadd.f32 %v534_v61, %v525_v59 }
  0x94   : > { %1063 = vmatmul.mubr.msk.f32.vlgmr.msra.gmra.mrb[0].mxu0 %vm552_vm1, %v535_v62  ;;  %v647_v1 = vpop.permute.xlu0 %646 }
  0x95   : > { %v639_v0 = vpop.permute.xlu1 %638  ;;  %v650_v2 = vmul.f32 %v647_v1, %v487_v35  ;;  %v649_v3 = vmul.f32 %v647_v1, %v486_v36 }
  0x99   : > { %v655_v5 = vpop.permute.xlu1 %654 }
  0x9a   : > { %v658_v9 = vadd.f32 %v655_v5, %v650_v2  ;;  %v657_v12 = vadd.f32 %v655_v5, %v649_v3 }
  0x9c   : > { %v668_v16 = vmul.f32 0.2, %v658_v9  ;;  %vm666_vm4 = vcmp.ge.f32.partialorder %v658_v9, 0.0  ;;  %v667_v17 = vmul.f32 0.2, %v657_v12  ;;  %vm665_vm5 = vcmp.ge.f32.partialorder %v657_v12, 0.0 }
  0x9d   : > { %v980_v24 = vpop.permute.xlu1 %979 }
  0x9e   : > { %v670_v21 = vsel %vm666_vm4, %v658_v9, %v668_v16  ;;  %v669_v22 = vsel %vm665_vm5, %v657_v12, %v667_v17 }
 0x167   : > { %v622_v4 = vpop.f32.mrb[0].mxu0 }
 0x168   : > { %v633_v6 = vmul.f32 %v631_v63, %v622_v4  ;;  %v624_v7 = vpop.f32.mrb[1].mxu0 }
 0x169   : > { %v634_v10 = vmul.f32 %v631_v63, %v624_v7  ;;  %751 = vmatprep.subr.mxu1 %v624_v7 }
 0x16a   : > { %v641_v11 = vadd.f32 %v639_v0, %v633_v6  ;;  %752 = vmatpush1.msra.mxu1 %v622_v4 }
 0x16b   : > { %v642_v13 = vadd.f32 %v639_v0, %v634_v10  ;;  %1065 = vmatmul.mubr.msk.f32.vlgmr.msra.gmra.mrb[0].mxu1 %vm673_vm0, %v671_v8 }
 0x16c   : > { %v661_v14 = vmul.f32 0.2, %v641_v11  ;;  %890 = vmatprep.mubr.f32.mxu1 %v1125_v30  ;;  %vm659_vm3 = vcmp.ge.f32.partialorder %v641_v11, 0.0 }
 0x16d   : > { %vm660_vm2 = vcmp.ge.f32.partialorder %v642_v13, 0.0  ;;  %v662_v15 = vmul.f32 0.2, %v642_v13 }
 0x16e   : > { %v663_v19 = vsel %vm659_vm3, %v641_v11, %v661_v14 }
 0x16f   : > { %v664_v18 = vsel %vm660_vm2, %v642_v13, %v662_v15 }
 0x170   : > { %826 = vmatprep.subr.mxu1 %v664_v18 }
 0x171   : > { %827 = vmatpush1.msra.mxu1 %v663_v19 }
 0x172   : > { %903 = vmatprep.subr.mxu1 %v670_v21 }
 0x173   : > { %1066 = vmatmul.mubr.msk.f32.vlgmr.msra.gmra.mrb[0].mxu1 %vm673_vm0, %v822_v20 }
 0x174   : > { %904 = vmatpush1.msra.mxu1 %v669_v22  ;;  %967 = vmatprep.mubr.f32.mxu1 %v1125_v30 }
 0x17b   : > { %1067 = vmatmul.mubr.msk.f32.vlgmr.msra.gmra.mrb[0].mxu1 %vm673_vm0, %v899_v23 }
 0x24e   : > { %v969_v25 = vpop.f32.mrb[0].mxu1 }
 0x24f   : > { %v982_v26 = vadd.f32 %v980_v24, %v969_v25  ;;  %v971_v27 = vpop.f32.mrb[1].mxu1 }
 0x250   : > { %v983_v28 = vadd.f32 %v980_v24, %v971_v27 }
 0x251   : > { %984 = vst [vmem:[%s484_s24] sm:$0xff] %v982_v26 }
 0x252   : > { %985 = vst [vmem:[%s484_s24 + $0x8] sm:$0xff] %v983_v28 }
 0x253 PF: > { %s24_s29 = sadd.s32 1, %s1119_s29  }
 0x254   : > { %p21_p4 = scmp.ge.s32.totalorder %s24_s29, 4  }
 0x256   :  { %23 = sbr.rel (!%p21_p4) target bundleno = 1 (0x1), region = 109 }

</bundles_post_ra>
